<compile_context>
chip_gen: v5e
topology: v5e:2x2
jax: 0.10.0
libtpu: 0.0.40
codegen_flags: <defaults>
</compile_context>

<pallas_src>
import functools

import jax
import jax.numpy as jnp
import numpy as np
from jax.experimental import pallas as pl
from jax.experimental.pallas import tpu as pltpu


# ----------------------------------------------------------------------------
# Pallas kernel: fused LayerNorm (no affine) + AdaLN modulation
# ----------------------------------------------------------------------------

def _adaln_zero_kernel(x_ref, gb_ref, o_ref, *, eps):
    # x_ref:  (TILE_N, D)  rows of one batch element
    # gb_ref: (2, D)       [gamma; beta] for this batch element
    # o_ref:  (TILE_N, D)
    x = x_ref[...].astype(jnp.float32)
    d = x.shape[-1]
    inv_d = jnp.float32(1.0 / d)

    # Single pass over x: sum and sum-of-squares, then mean / variance.
    s = jnp.sum(x, axis=-1, keepdims=True)
    sq = jnp.sum(x * x, axis=-1, keepdims=True)
    mean = s * inv_d
    var = jnp.maximum(sq * inv_d - mean * mean, 0.0)  # guard f32 cancellation
    rstd = jax.lax.rsqrt(var + eps)

    gamma = gb_ref[0:1, :].astype(jnp.float32)   # (1, D) -> broadcast over rows
    beta = gb_ref[1:2, :].astype(jnp.float32)    # (1, D)

    o_ref[...] = ((x - mean) * rstd * gamma + beta).astype(o_ref.dtype)


# ----------------------------------------------------------------------------
# Tiling / VMEM budgeting helpers
# ----------------------------------------------------------------------------

_MiB = 1024 * 1024


def _vmem_capacity_bytes():
    """Physical VMEM per core; conservative fallback if query unavailable."""
    try:
        return int(pltpu.get_tpu_info().vmem_capacity_bytes)
    except Exception:
        return 64 * _MiB   # v7x per-TensorCore (smallest of v5e/v6e/v7x)


def _pick_row_tile(n, d, itemsize, vmem_cap):
    """Byte-budget-aware row tile.

    Targets ~2-4 MiB per (tile_n, D) block (capped by VMEM capacity so that
    double-buffered x + out blocks fit), rounded to the sublane packing for the
    dtype and clamped to [row_align, round_up(n, row_align)].
    """
    row_align = 8 if itemsize >= 4 else (16 if itemsize == 2 else 32)

    # Per-block byte target: 4 MiB, but never more than ~1/16 of physical VMEM
    # (x + out, each double-buffered -> ~1/4 of VMEM for the big streams).
    target_bytes = min(4 * _MiB, max(_MiB, vmem_cap // 16))

    row_bytes = max(1, d * itemsize)
    rows_by_budget = max(row_align, (target_bytes // row_bytes) // row_align * row_align)

    n_aligned = ((n + row_align - 1) // row_align) * row_align
    tile = min(rows_by_budget, n_aligned)
    tile = max(row_align, (tile // row_align) * row_align)
    return tile


def adaln_zero_forward(x, cond, *, eps=1e-5):
    """AdaLNZeroBlock.forward.

    Args:
      x:    [B, N, D] float array.
      cond: [B, 3*D] (or [B, 3, D]) conditioning; rows are (alpha, gamma, beta).
    Returns:
      (out_ln [B, N, D], alpha [B, D])
    """
    B, N, D = x.shape
    cond_3d = cond.reshape(B, 3, D)
    # alpha is a pure view (no compute): return it from the wrapper, never DMA it.
    alpha = cond_3d[:, 0, :]
    # Only gamma/beta go to the kernel.
    cond_gb = cond_3d[:, 1:3, :]                       # [B, 2, D]

    itemsize = jnp.dtype(x.dtype).itemsize
    vmem_cap = _vmem_capacity_bytes()

    tile_n = _pick_row_tile(N, D, itemsize, vmem_cap)
    num_row_tiles = -(-N // tile_n)                    # cdiv
    n_pad = num_row_tiles * tile_n

    # Pad awkward N up to a multiple of the tile (row stats are independent per
    # row, so padded rows never affect valid output rows; they are sliced off).
    x_in = x if n_pad == N else jnp.pad(x, ((0, 0), (0, n_pad - N), (0, 0)))

    # Explicit VMEM budget: double-buffered x and out blocks + cond block + headroom.
    x_block_bytes = tile_n * D * itemsize
    cond_block_bytes = 8 * D * jnp.dtype(cond_gb.dtype).itemsize   # sublane-padded
    needed = 2 * (2 * x_block_bytes) + 2 * cond_block_bytes
    vmem_limit = int(needed * 1.5) + 4 * _MiB
    vmem_limit = max(vmem_limit, 32 * _MiB)            # generous floor for compiler scratch
    vmem_limit = min(vmem_limit, int(vmem_cap * 0.9))  # never exceed physical VMEM

    out_pad = pl.pallas_call(
        functools.partial(_adaln_zero_kernel, eps=eps),
        out_shape=jax.ShapeDtypeStruct((B, n_pad, D), x.dtype),
        grid=(B, num_row_tiles),
        in_specs=[
            # batch dim squeezed; kernel sees (tile_n, D)
            pl.BlockSpec((None, tile_n, D), lambda b, n: (b, n, 0)),
            # (2, D) gamma/beta block for this batch element (re-DMA'd once per b)
            pl.BlockSpec((None, 2, D), lambda b, n: (b, 0, 0)),
        ],
        out_specs=pl.BlockSpec((None, tile_n, D), lambda b, n: (b, n, 0)),
        compiler_params=pltpu.CompilerParams(
            dimension_semantics=("parallel", "parallel"),
            vmem_limit_bytes=vmem_limit,
        ),
    )(x_in, cond_gb)

    out_ln = out_pad if n_pad == N else out_pad[:, :N, :]
    return out_ln, alpha


# ----------------------------------------------------------------------------
# Pure-JAX reference (for correctness check only) - two-pass LayerNorm
# ----------------------------------------------------------------------------

def _reference(x, cond, eps=1e-5):
    B, N, D = x.shape
    c = cond.reshape(B, 3, D)
    mean = jnp.mean(x, axis=-1, keepdims=True)
    var = jnp.mean(jnp.square(x - mean), axis=-1, keepdims=True)
    x_ln = (x - mean) / jnp.sqrt(var + eps)
    out = c[:, 1, :][:, None, :] * x_ln + c[:, 2, :][:, None, :]
    return out, c[:, 0, :]


# ----------------------------------------------------------------------------
# Main
# ----------------------------------------------------------------------------

if __name__ == "__main__":
    B, N, D = 2, 16, 128   # small, lane-dense (D multiple of 128, N multiple of 8)

    key = jax.random.PRNGKey(0)
    kx, kc = jax.random.split(key)
    x = jax.random.normal(kx, (B, N, D), jnp.float32)
    cond = jax.random.normal(kc, (B, 3 * D), jnp.float32)

    fwd = jax.jit(adaln_zero_forward)
    out_ln, alpha = fwd(x, cond)
    jax.block_until_ready((out_ln, alpha))

    assert out_ln.shape == (B, N, D), out_ln.shape
    assert alpha.shape == (B, D), alpha.shape

    ref_out, ref_alpha = _reference(x, cond)
    np.testing.assert_allclose(np.asarray(out_ln), np.asarray(ref_out),
                               rtol=1e-5, atol=3e-5)
    np.testing.assert_allclose(np.asarray(alpha), np.asarray(ref_alpha),
                               rtol=0, atol=0)

    # Also exercise an awkward (non-divisible) N to cover the padding path.
    N2 = 21
    x2 = jax.random.normal(kx, (B, N2, D), jnp.float32)
    out2, alpha2 = jax.jit(adaln_zero_forward)(x2, cond)
    jax.block_until_ready((out2, alpha2))
    ref2, ref_a2 = _reference(x2, cond)
    np.testing.assert_allclose(np.asarray(out2), np.asarray(ref2),
                               rtol=1e-5, atol=3e-5)
    np.testing.assert_allclose(np.asarray(alpha2), np.asarray(ref_a2),
                               rtol=0, atol=0)

    print("KERNEL_OK")
</pallas_src>

<mosaic_0001>
module attributes {stable_mosaic.version = 11 : i64} {
  func.func @_adaln_zero_kernel(%arg0: i32, %arg1: i32, %arg2: memref<1x16x128xf32, #tpu.memory_space<vmem>>, %arg3: memref<1x2x128xf32, #tpu.memory_space<vmem>>, %arg4: memref<1x16x128xf32, #tpu.memory_space<vmem>>) attributes {dimension_semantics = [#tpu.dimension_semantics<parallel>, #tpu.dimension_semantics<parallel>], iteration_bounds = array<i64: 2, 1>, scalar_prefetch = 0 : i64, scratch_operands = 0 : i64, tpu.core_type = #tpu.core_type<tc>, window_params = [{transform_indices = @transform_0, window_bounds = array<i64: 1, 16, 128>}, {transform_indices = @transform_1, window_bounds = array<i64: 1, 2, 128>}, {transform_indices = @transform_2, window_bounds = array<i64: 1, 16, 128>}]} {
    %c0 = arith.constant 0 : index
    %c0_0 = arith.constant 0 : index
    %c0_1 = arith.constant 0 : index
    %0 = vector.load %arg2[%c0, %c0_0, %c0_1] : memref<1x16x128xf32, #tpu.memory_space<vmem>>, vector<1x16x128xf32>
    %1 = vector.shape_cast %0 : vector<1x16x128xf32> to vector<16x128xf32>
    %cst = arith.constant dense<0.000000e+00> : vector<16xf32>
    %2 = vector.multi_reduction <add>, %1, %cst [1] : vector<16x128xf32> to vector<16xf32>
    %3 = vector.shape_cast %2 : vector<16xf32> to vector<16x1xf32>
    %4 = arith.mulf %1, %1 : vector<16x128xf32>
    %cst_2 = arith.constant dense<0.000000e+00> : vector<16xf32>
    %5 = vector.multi_reduction <add>, %4, %cst_2 [1] : vector<16x128xf32> to vector<16xf32>
    %6 = vector.shape_cast %5 : vector<16xf32> to vector<16x1xf32>
    %cst_3 = arith.constant 7.812500e-03 : f32
    %7 = vector.broadcast %cst_3 : f32 to vector<16x1xf32>
    %8 = arith.mulf %3, %7 : vector<16x1xf32>
    %cst_4 = arith.constant 7.812500e-03 : f32
    %9 = vector.broadcast %cst_4 : f32 to vector<16x1xf32>
    %10 = arith.mulf %6, %9 : vector<16x1xf32>
    %11 = arith.mulf %8, %8 : vector<16x1xf32>
    %12 = arith.subf %10, %11 : vector<16x1xf32>
    %cst_5 = arith.constant 0.000000e+00 : f32
    %13 = vector.broadcast %cst_5 : f32 to vector<16x1xf32>
    %14 = arith.maximumf %12, %13 : vector<16x1xf32>
    %cst_6 = arith.constant 9.99999974E-6 : f32
    %15 = vector.broadcast %cst_6 : f32 to vector<16x1xf32>
    %16 = arith.addf %14, %15 : vector<16x1xf32>
    %17 = math.rsqrt %16 : vector<16x1xf32>
    %c0_7 = arith.constant 0 : index
    %c0_8 = arith.constant 0 : index
    %c0_9 = arith.constant 0 : index
    %18 = vector.load %arg3[%c0_7, %c0_8, %c0_9] : memref<1x2x128xf32, #tpu.memory_space<vmem>>, vector<1x1x128xf32>
    %19 = vector.shape_cast %18 : vector<1x1x128xf32> to vector<1x128xf32>
    %c0_10 = arith.constant 0 : index
    %c1 = arith.constant 1 : index
    %c0_11 = arith.constant 0 : index
    %20 = vector.load %arg3[%c0_10, %c1, %c0_11] : memref<1x2x128xf32, #tpu.memory_space<vmem>>, vector<1x1x128xf32>
    %21 = vector.shape_cast %20 : vector<1x1x128xf32> to vector<1x128xf32>
    %22 = vector.broadcast %8 : vector<16x1xf32> to vector<16x128xf32>
    %23 = arith.subf %1, %22 : vector<16x128xf32>
    %24 = vector.broadcast %17 : vector<16x1xf32> to vector<16x128xf32>
    %25 = arith.mulf %23, %24 : vector<16x128xf32>
    %26 = vector.broadcast %19 : vector<1x128xf32> to vector<16x128xf32>
    %27 = arith.mulf %25, %26 : vector<16x128xf32>
    %28 = vector.broadcast %21 : vector<1x128xf32> to vector<16x128xf32>
    %29 = arith.addf %27, %28 : vector<16x128xf32>
    %c0_12 = arith.constant 0 : index
    %c0_13 = arith.constant 0 : index
    %c0_14 = arith.constant 0 : index
    %30 = vector.load %arg4[%c0_12, %c0_13, %c0_14] : memref<1x16x128xf32, #tpu.memory_space<vmem>>, vector<1x16x128xf32>
    %31 = vector.shape_cast %30 : vector<1x16x128xf32> to vector<16x128xf32>
    %32 = vector.shape_cast %29 : vector<16x128xf32> to vector<1x16x128xf32>
    tpu.vector_store %arg4[%c0_12, %c0_13, %c0_14], %32 {strides = array<i32>} : memref<1x16x128xf32, #tpu.memory_space<vmem>>, vector<1x16x128xf32>,
    return
  }
  func.func @transform_0(%arg0: i32, %arg1: i32) -> (i32, i32, i32) {
    %c0_i32 = arith.constant 0 : i32
    %c0_i32_0 = arith.constant 0 : i32
    return %arg0, %arg1, %c0_i32 : i32, i32, i32
  }
  func.func @transform_1(%arg0: i32, %arg1: i32) -> (i32, i32, i32) {
    %c0_i32 = arith.constant 0 : i32
    %c0_i32_0 = arith.constant 0 : i32
    %c0_i32_1 = arith.constant 0 : i32
    return %arg0, %c0_i32, %c0_i32_0 : i32, i32, i32
  }
  func.func @transform_2(%arg0: i32, %arg1: i32) -> (i32, i32, i32) {
    %c0_i32 = arith.constant 0 : i32
    %c0_i32_0 = arith.constant 0 : i32
    return %arg0, %arg1, %c0_i32 : i32, i32, i32
  }
}

</mosaic_0001>

<bundles_post_ra>
// kernel: adaln_zero_forward.1
= control target key start
LH: loop header
LB: loop body
LE: loop exit
PB: predicated region body
PF: predicated region fallthrough
CT: control target
= control target key end

     0   :  { %7 = vsyncpa [#allocation3], 0  ;;  %s732_s0 = inlined_call_operand.hbm [shape: f32[2,16,128], index: 0, kind: input, shape index: {}]   ;;  %s733_s1 = inlined_call_operand.vmem [shape: f32[2,2,128], index: 1, kind: input, shape index: {}]   ;;  %s734_s2 = inlined_call_operand.hbm [shape: f32[2,16,128], index: 2, kind: output, shape index: {}]  }
   0x1   :  { %9 = vsyncpa [#allocation3 + $0x1], 0 }
   0x2   :  { %10 = vsyncpa [#allocation4], 0 }
   0x3   :  { %12 = vsyncpa [#allocation4 + $0x1], 0  ;;  %s599_s9 = smov 0   ;;  %s601_s10 = smov 0  }
   0x4   :  { %s603_s11 = smov 0   ;;  %s605_s12 = smov 0  }
   0x5   :  { %s607_s13 = smov 0   ;;  %s609_s14 = smov 0  }
   0x6 LB: > { %s376_s15 = sadd.s32 4294967295, %s578_s14   ;;  %s377_s16 = sadd.s32 4294967294, %s578_s14   ;;  %s578_s14 = sphi %s609_s14, %s18_s14   ;;  %s574_s13 = sphi %s607_s13, %s743_s13   ;;  %s570_s12 = sphi %s605_s12, %s742_s12   ;;  %s566_s11 = sphi %s603_s11, %s741_s11   ;;  %s562_s10 = sphi %s601_s10, %s740_s10   ;;  %s558_s9 = sphi %s599_s9, %s739_s9  }
   0x7   : > { %s30_s17 = sadd.s32 1, %s574_s13  ;;  %s39_s18 = sadd.s32 1, %s566_s11 }
   0x8   : > { %p32_p0 = scmp.ge.s32.totalorder %s30_s17, 2  ;;  %p46_p1 = scmp.ne.s32.totalorder %s566_s11, %s562_s10 }
   0x9   : > { %p47_p2 = scmp.eq.s32.totalorder %s578_s14, 0  ;;  %p52_p3 = scmp.ne.s32.totalorder %s562_s10, %s558_s9 }
   0xa   : > { %s745_s17 = smov (%p32_p0, %s30_s17), 0  ;;  %p53_p5 = scmp.eq.s32.totalorder %s376_s15, 0 }
   0xb   : > { %p640_p4 = por %p47_p2, %p46_p1  ;;  %s34_s20 = ssub.s32 %s574_s13, %s745_s17 }
   0xc   : > { %p104_p6 = scmp.eq.s32.totalorder %s376_s15, 1  ;;  %p37_p7 = scmp.eq.s32.totalorder %s34_s20, 0 }
   0xd   : > { %p646_p8 = por %p53_p5, %p52_p3  ;;  %p110_p10 = scmp.eq.s32.totalorder %s377_s16, 1 }
   0xe   : > { %p650_p9 = por %p104_p6, %p46_p1  ;;  %p379_p12 = scmp.ge.s32.totalorder %s578_s14, 2 }
   0xf   : > { %s655_s23 = scalar_select %p37_p7, %s566_s11, %s39_s18  }
  0x10   : > { %p657_p11 = por %p110_p10, %p52_p3  ;;  %p406_p13 = scmp.lt.s32.totalorder %s578_s14, 2 }
  0x11   : > { %s130_s25 = sand.u32 1, %s566_s11   ;;  %s392_s27 = sshll.u32 %s574_s13, 4 }
  0x12   : > { %s380_s26 = sshll.u32 %s130_s25, 4  ;;  %s141_s30 = scalar_lea.hbm %s732_s0, %s392_s27 }
  0x13   : > { %s134_s3 = scalar_lea.vmem [#allocation2], %s380_s26  ;;  %s142_s5 = sshll.u32 %s141_s30, 4  ;;  %s143_s5 = int_to_ptr.hbm [resolvable:$true] %s142_s5 }
  0x14   : > { %s144_s4 = sshll.u32 %s134_s3, 4  ;;  %p399_p0 = pnand %p406_p13, %p640_p4  ;;  %s145_s4 = int_to_ptr.vmem [resolvable:$true] %s144_s4 }
  0x15   : > { %p383_p1 = scmp.ge.s32.totalorder %s578_s14, 1  ;;  %s131_s6 = scalar_lea.sflag [#allocation3], %s130_s25 }
  0x16   : > { %s580_s7 = smov 128   ;;  %s581_s8 = smov 8  }
  0x17   : > { %401 = dma.hbm_to_vmem [thread:$0]  (!%p399_p0), %s143_s5, 256, %s145_s4, %s131_s6, %s580_s7, %s580_s7, %s581_s8  }
  0x18   : > { %p159_p2 = scmp.lt.s32.totalorder %s578_s14, 3 }
  0x1a   : > { %p160_p3 = pnand %p383_p1, %p159_p2 }
  0x1b   : > { %s673_s15 = sand.u32 (!%p160_p3), 1, %s562_s10  }
  0x1c   : > { %163 = sbr.rel (%p160_p3) target bundleno = 197 (0xc5), region = 28  ;;  %s384_s16 = sshll.u32 (!%p160_p3), %s673_s15, 4 }
  0x1d   : > { %s166_s18 = scalar_lea.sflag (!%p160_p3), [#allocation3], %s673_s15  ;;  %s169_s19 = scalar_lea.vmem (!%p160_p3), [#allocation2], %s384_s16 }
  0x21   : > { %549 = dma.done.wait (%p646_p8), %s166_s18, 256  }
  0x22   : > { %551 = vsyncadd (%p646_p8), %s166_s18, 4294967040  ;;  %p196_p4 = scmp.lt.s32.totalorder %s570_s12, 1  ;;  %v201_v0 = vld [vmem:[%s169_s19] sm:$0xff]  ;;  %v202_v2 = vld [vmem:[%s169_s19 + $0x8] sm:$0xff]  ;;  %s393_s21 = sshll.u32 %s570_s12, 4 }
  0x23   : > { %203 = vadd.xlane.f32.xlu0 %v201_v0  ;;  %v207_v1 = vmul.f32 %v201_v0, %v201_v0  ;;  %v208_v3 = vmul.f32 %v202_v2, %v202_v2  ;;  %s194_s29 = scalar_lea.vmem [#allocation5], %s384_s16  ;;  %s273_s4 = scalar_lea.hbm %s734_s2, %s393_s21 }
  0x24   : > { %s197_s20 = scalar_select %p196_p4, %s570_s12, 1 }
  0x25   : > { %209 = vadd.xlane.f32.xlu1 %v207_v1  ;;  %s274_s5 = sshll.u32 %s194_s29, 4  ;;  %s276_s12 = sshll.u32 %s273_s4, 4  ;;  %s275_s5 = int_to_ptr.vmem [resolvable:$true] %s274_s5  ;;  %s277_s12 = int_to_ptr.hbm [resolvable:$true] %s276_s12 }
  0x26   : > { %s386_s25 = sshll.u32 %s197_s20, 1  ;;  %s260_s6 = scalar_lea.sflag [#allocation4], %s673_s15 }
  0x27   : > { %s688_s28 = scalar_lea.vmem %s733_s1, %s386_s25  ;;  %s510_s7 = sshra.s32 %s277_s12, 4  ;;  %s511_s7 = int_to_ptr.hbm [resolvable:$true] %s510_s7 }
  0x28   : > { %v460_v28 = vld [vmem:[%s688_s28] ss:$0 sm:$0xff]  ;;  %v461_v31 = vld [vmem:[%s688_s28 + $0x1] ss:$0 sm:$0xff]  ;;  %s512_s8 = scalar_lea.hbm %s511_s7, 16  ;;  %s516_s19 = scalar_lea.hbm %s734_s2, 32 }
  0x29   : > { %p513_p5 = scmp.ne.s32.totalorder %s511_s7, %s512_s8  ;;  %p517_p8 = scmp.lt.s32.totalorder %s511_s7, %s734_s2 }
  0x2a   : > { %p518_p10 = scmp.lt.s32.totalorder %s516_s19, %s512_s8 }
  0x2b   : > { %205 = vadd.xlane.f32.xlu0 %v202_v2  ;;  %p514_p6 = pnand %p513_p5, %p650_p9 }
  0x2c   : > { %p519_p13 = por %p518_p10, %p517_p8 }
  0x2d   : > { %211 = vadd.xlane.f32.xlu1 %v208_v3  ;;  %p515_p7 = pneg %p514_p6 }
  0x2f   : > { %p520_p0 = pnand %p519_p13, %p515_p7 }
  0x96   : > { %v204_v4 = vpop.xlane.xlu0 %203 }
  0x97   : > { %v213_v5 = vmul.f32 0.0078125, %v204_v4 }
  0x98   : > { %v210_v6 = vpop.xlane.xlu1 %209 }
  0x99   : > { %v217_v7 = vmul.f32 %v213_v5, %v213_v5  ;;  %v215_v8 = vmul.f32 0.0078125, %v210_v6  ;;  %v247_v27 = vsub.f32 %v201_v0, %v213_v5 }
  0x9b   : > { %v219_v9 = vsub.f32 %v215_v8, %v217_v7 }
  0x9d   : > { %v221_v10 = vmax.f32 %v219_v9, 0.0 }
  0x9e   : > { %v206_v11 = vpop.xlane.xlu0 %205 }
  0x9f   : > { %v223_v12 = vadd.f32 1e-05, %v221_v10  ;;  %v214_v13 = vmul.f32 0.0078125, %v206_v11 }
  0xa0   : > { %v212_v14 = vpop.xlane.xlu1 %211 }
  0xa1   : > { %462 = vrsqrt.f32 %v223_v12  ;;  %v218_v15 = vmul.f32 %v214_v13, %v214_v13  ;;  %v216_v16 = vmul.f32 0.0078125, %v212_v14  ;;  %vm231_vm1 = vweird.f32 %v223_v12 }
  0xa2   : > { %v248_v39 = vsub.f32 %v202_v2, %v214_v13 }
  0xa3   : > { %v220_v17 = vsub.f32 %v216_v16, %v218_v15 }
  0xa5   : > { %v222_v18 = vmax.f32 %v220_v17, 0.0 }
  0xa7   : > { %v463_v19 = vpop.eup %462  ;;  %v224_v21 = vadd.f32 1e-05, %v222_v18 }
  0xa8   : > { %v226_v20 = vmul.f32 %v463_v19, %v223_v12  ;;  %vm232_vm0 = vweird.f32 %v463_v19 }
  0xa9   : > { %464 = vrsqrt.f32 %v224_v21  ;;  %vm233_vm2 = vmor %vm231_vm1, %vm232_vm0  ;;  %vm241_vm4 = vweird.f32 %v224_v21 }
  0xaa   : > { %v227_v22 = vmul.f32 %v463_v19, %v226_v20 }
  0xac   : > { %v228_v23 = vmul.f32 0.5, %v227_v22 }
  0xae   : > { %v229_v24 = vsub.f32 1.5, %v228_v23 }
  0xaf   : > { %v465_v25 = vpop.eup %464 }
  0xb0   : > { %v230_v26 = vmul.f32 %v463_v19, %v229_v24  ;;  %v236_v29 = vmul.f32 %v465_v25, %v224_v21  ;;  %vm242_vm3 = vweird.f32 %v465_v25 }
  0xb1   : > { %vm243_vm5 = vmor %vm241_vm4, %vm242_vm3 }
  0xb2   : > { %v234_v30 = vsel %vm233_vm2, %v463_v19, %v230_v26  ;;  %v237_v33 = vmul.f32 %v465_v25, %v236_v29 }
  0xb3   : > { %v249_v32 = vmul.f32 %v247_v27, %v234_v30 }
  0xb4   : > { %v238_v35 = vmul.f32 0.5, %v237_v33 }
  0xb5   : > { %v252_v34 = vmul.f32 %v460_v28, %v249_v32 }
  0xb6   : > { %v239_v37 = vsub.f32 1.5, %v238_v35 }
  0xb7   : > { %v255_v36 = vadd.f32 %v461_v31, %v252_v34 }
  0xb8   : > { %v240_v38 = vmul.f32 %v465_v25, %v239_v37 }
  0xb9   : > { %257 = vst [vmem:[%s194_s29] sm:$0xff] %v255_v36 }
  0xba   : > { %v244_v40 = vsel %vm243_vm5, %v465_v25, %v240_v38 }
  0xbb   : > { %v250_v41 = vmul.f32 %v248_v39, %v244_v40 }
  0xbd   : > { %v253_v42 = vmul.f32 %v460_v28, %v250_v41 }
  0xbf   : > { %v256_v43 = vadd.f32 %v461_v31, %v253_v42 }
  0xc1   : > { %258 = vst [vmem:[%s194_s29 + $0x8] sm:$0xff] %v256_v43 }
  0xc2   : > { %523 = shalt.err (!%p520_p0)
}
  0xc3   : > { %s582_s15 = smov 128   ;;  %s583_s26 = smov 8  }
  0xc4   : > { %396 = dma.vmem_to_hbm [thread:$0]  (%p650_p9), %s275_s5, 256, %s277_s12, %s260_s6, %s582_s15, %s582_s15, %s583_s26  }
  0xc5 PF: > { %s291_s27 = sand.u32 1, %s558_s9   ;;  %p403_p1 = pnand %p379_p12, %p657_p11 }
  0xc6   : > { %s292_s28 = scalar_lea.sflag [#allocation4], %s291_s27 }
  0xc7   : > { %p404_p2 = pneg %p403_p1 }
  0xc9   : > { %553 = dma.done.wait (%p404_p2), %s292_s28, 256  }
  0xca   : > { %555 = vsyncadd (%p404_p2), %s292_s28, 4294967040  ;;  %s18_s14 = sadd.s32 1, %s578_s14   ;;  %s739_s9 = smov %s562_s10 }
  0xcb   : > { %p15_p3 = scmp.ge.s32.totalorder %s18_s14, 4   ;;  %s740_s10 = smov %s566_s11 }
  0xcc   : > { %s741_s11 = smov %s655_s23  ;;  %s742_s12 = smov %s574_s13 }
  0xcd   : > { %s743_s13 = smov %s745_s17  ;;  %17 = sbr.rel (!%p15_p3) target bundleno = 6 (0x6), region = 76 }
  0xd2   :  { %298 = vsyncpa [#allocation3], 1 }
  0xd3   :  { %300 = vsyncpa [#allocation3 + $0x1], 1 }
  0xd4   :  { %301 = vsyncpa [#allocation4], 1 }
  0xd5   :  { %303 = vsyncpa [#allocation4 + $0x1], 1 }

</bundles_post_ra>
